<compile_context>
chip_gen: v6e
topology: v6e:2x2x1
jax: 0.10.0
libtpu: 0.0.40
codegen_flags: <defaults>
</compile_context>

<pallas_src>
import math

import jax
import jax.numpy as jnp
from jax import lax
from jax.experimental import pallas as pl
from jax.experimental.pallas import tpu as pltpu


# ----------------------------- in-kernel helpers -----------------------------
def _layernorm(x, g, eps=1e-5):
    mu = jnp.mean(x, axis=-1, keepdims=True)
    xc = x - mu
    var = jnp.mean(xc * xc, axis=-1, keepdims=True)
    return xc * lax.rsqrt(var + eps) * g


# ----------------------- fused transformer-stack kernel ----------------------
def _make_stack_kernel(n_head, bb, t, d):
    dk = d // n_head
    scale = 1.0 / math.sqrt(dk)

    def kernel(x_ref, wqkv_ref, wo_ref, g1_ref, w1_ref, w2_ref, g2_ref, gf_ref,
               o_ref, concat_ref):
        layer = pl.program_id(1)
        last = pl.num_programs(1) - 1

        # layer 0: seed the VMEM-resident fp32 carry with the embedded input
        @pl.when(layer == 0)
        def _():
            o_ref[...] = x_ref[...]

        x = o_ref[...].reshape(bb * t, d)            # (M, D) fp32 carry
        xb = x.astype(jnp.bfloat16)

        # fused QKV projection: one lane-dense bf16 (M, D) @ (D, 3D) MXU call
        qkv = jnp.dot(xb, wqkv_ref[0], preferred_element_type=jnp.float32)
        qkvb = qkv.astype(jnp.bfloat16).reshape(bb, t, 3 * d)

        for h in range(n_head):                      # static head loop
            q = qkvb[:, :, h * dk:(h + 1) * dk]                        # (Bb,T,dk)
            k = qkvb[:, :, d + h * dk:d + (h + 1) * dk]
            v = qkvb[:, :, 2 * d + h * dk:2 * d + (h + 1) * dk]
            # contract last dims directly (no explicit k transpose)
            s = jnp.einsum('bqd,bkd->bqk', q, k,
                           preferred_element_type=jnp.float32) * scale
            s = s - jnp.max(s, axis=-1, keepdims=True)
            p = jnp.exp(s)
            p = p * pl.reciprocal(jnp.sum(p, axis=-1, keepdims=True),
                                  approx=True)
            o_h = jnp.einsum('bqk,bkd->bqd', p.astype(jnp.bfloat16), v,
                             preferred_element_type=jnp.float32)
            # write head output into the concat slab -> bounds live ranges
            concat_ref[:, h * dk:(h + 1) * dk] = (
                o_h.reshape(bb * t, dk).astype(jnp.bfloat16))

        # single lane-dense output projection from the slab
        attn = jnp.dot(concat_ref[...], wo_ref[0],
                       preferred_element_type=jnp.float32)
        h1 = _layernorm(x + attn, g1_ref[0])
        hidden = jnp.maximum(
            jnp.dot(h1.astype(jnp.bfloat16), w1_ref[0],
                    preferred_element_type=jnp.float32), 0.0)
        ff = jnp.dot(hidden.astype(jnp.bfloat16), w2_ref[0],
                     preferred_element_type=jnp.float32)
        out = _layernorm(h1 + ff, g2_ref[0])

        # final layernorm folded into the last layer step (keeps the LM head
        # kernel a pure matmul)
        @pl.when(layer == last)
        def _():
            o_ref[...] = _layernorm(out, gf_ref[...]).reshape(bb, t, d)

        @pl.when(layer != last)
        def _():
            o_ref[...] = out.reshape(bb, t, d)

    return kernel


def transformer_stack(x, wqkv, wo, g1, w1, w2, g2, gf, *, n_head, n_bsplit=1):
    B, T, D = x.shape
    L = wqkv.shape[0]
    D4 = w1.shape[2]
    assert D % n_head == 0
    assert B % n_bsplit == 0
    Bb = B // n_bsplit
    M = B * T

    def wspec(d1, d2):
        return pl.BlockSpec((1, d1, d2), lambda c, l: (l, 0, 0))

    matmul_flops = 2 * M * (4 * D * D + 2 * D * D4)
    attn_flops = 4 * B * T * T * D
    cost = pl.CostEstimate(
        flops=int(L * (matmul_flops + attn_flops)),
        transcendentals=int(L * B * n_head * T * T),
        bytes_accessed=int(L * (4 * D * D + 2 * D * D4) * 2 + 2 * M * D * 4),
    )
    # bf16 per-layer weights, double-buffered, + activation blocks + scratch
    w_bytes = (4 * D * D + 2 * D * D4) * 2
    vmem_est = 2 * w_bytes + 4 * Bb * T * D * 4 + Bb * T * D * 2
    vmem_limit = int(min(64 << 20, max(32 << 20, 2 * vmem_est)))

    return pl.pallas_call(
        _make_stack_kernel(n_head, Bb, T, D),
        out_shape=jax.ShapeDtypeStruct((B, T, D), jnp.float32),
        grid_spec=pltpu.PrefetchScalarGridSpec(
            num_scalar_prefetch=0,
            grid=(n_bsplit, L),                      # layer axis last (carry)
            in_specs=[
                pl.BlockSpec((Bb, T, D), lambda c, l: (c, 0, 0)),
                wspec(D, 3 * D),                     # fused QKV weight (bf16)
                wspec(D, D),                         # output projection
                wspec(1, D),                         # ln1 gain
                wspec(D, D4),                        # ff w1
                wspec(D4, D),                        # ff w2
                wspec(1, D),                         # ln2 gain
                pl.BlockSpec((1, D), lambda c, l: (0, 0)),   # final ln gain
            ],
            out_specs=pl.BlockSpec((Bb, T, D), lambda c, l: (c, 0, 0)),
            scratch_shapes=[pltpu.VMEM((Bb * T, D), jnp.bfloat16)],
        ),
        compiler_params=pltpu.CompilerParams(
            dimension_semantics=("parallel", "arbitrary"),
            vmem_limit_bytes=vmem_limit),
        cost_estimate=cost,
    )(x, wqkv, wo, g1, w1, w2, g2, gf)


# ------------------------------- LM head kernel -------------------------------
def _lm_head_kernel(x_ref, wh_ref, o_ref):
    b, t, d = x_ref.shape
    xb = x_ref[...].reshape(b * t, d).astype(jnp.bfloat16)
    y = jnp.dot(xb, wh_ref[...], preferred_element_type=jnp.float32)
    o_ref[...] = y.reshape(b, t, -1)


def lm_head(x, wh, *, tile_v=1024):
    B, T, D = x.shape
    V = wh.shape[1]
    # pad vocab to a lane-dense multiple of the tile, slice logits afterwards
    Vp = ((V + 127) // 128) * 128
    TV = min(tile_v, Vp)
    Vp = ((Vp + TV - 1) // TV) * TV
    if Vp != V:
        wh = jnp.pad(wh, ((0, 0), (0, Vp - V)))

    cost = pl.CostEstimate(
        flops=int(2 * B * T * D * Vp),
        transcendentals=0,
        bytes_accessed=int(D * Vp * 2 + B * T * D * 4 + B * T * Vp * 4))
    vmem_est = 2 * D * TV * 2 + B * T * D * 4 + 2 * B * T * TV * 4
    vmem_limit = int(min(64 << 20, max(32 << 20, 2 * vmem_est)))

    logits = pl.pallas_call(
        _lm_head_kernel,
        out_shape=jax.ShapeDtypeStruct((B, T, Vp), jnp.float32),
        grid_spec=pltpu.PrefetchScalarGridSpec(
            num_scalar_prefetch=0,
            grid=(Vp // TV,),
            in_specs=[
                pl.BlockSpec((B, T, D), lambda j: (0, 0, 0)),   # resident
                pl.BlockSpec((D, TV), lambda j: (0, j)),
            ],
            out_specs=pl.BlockSpec((B, T, TV), lambda j: (0, 0, j)),
        ),
        compiler_params=pltpu.CompilerParams(
            dimension_semantics=("parallel",),
            vmem_limit_bytes=vmem_limit),
        cost_estimate=cost,
    )(x, wh)
    return logits[..., :V]


# ------------------------------- full model ----------------------------------
def model_forward(idx, params):
    # embedding gather is glue (plain JAX); attn/FF/LN/head hot path is Pallas
    B, T = idx.shape
    x = (params["wte"][idx] + params["wpe"][:T][None, :, :]).astype(jnp.float32)
    n_bsplit = 2 if B % 2 == 0 else 1      # v7x: feed both TensorCores
    x = transformer_stack(x, params["wqkv"], params["wo"], params["g1"],
                          params["w1"], params["w2"], params["g2"],
                          params["gf"], n_head=params["n_head"],
                          n_bsplit=n_bsplit)
    return lm_head(x, params["wh"])


# ----------------------------- pure-JAX reference ----------------------------
def _ln_ref(x, g, eps=1e-5):
    mu = x.mean(-1, keepdims=True)
    var = ((x - mu) ** 2).mean(-1, keepdims=True)
    return (x - mu) / jnp.sqrt(var + eps) * g


def reference_forward(idx, wte, wpe, layers, gf, wh, n_head):
    T = idx.shape[1]
    x = wte[idx] + wpe[:T][None, :, :]
    B, _, D = x.shape
    dk = D // n_head
    for layer in layers:
        q = (x @ layer["wq"]).reshape(B, T, n_head, dk).transpose(0, 2, 1, 3)
        k = (x @ layer["wk"]).reshape(B, T, n_head, dk).transpose(0, 2, 1, 3)
        v = (x @ layer["wv"]).reshape(B, T, n_head, dk).transpose(0, 2, 1, 3)
        s = (q @ k.transpose(0, 1, 3, 2)) / math.sqrt(dk)
        a = jax.nn.softmax(s, axis=-1)
        o = (a @ v).transpose(0, 2, 1, 3).reshape(B, T, D)
        attn = o @ layer["wo"]
        x = _ln_ref(x + attn, layer["g1"])
        ff = jnp.maximum(x @ layer["w1"], 0.0) @ layer["w2"]
        x = _ln_ref(x + ff, layer["g2"])
    x = _ln_ref(x, gf)
    return x @ wh


# --------------------------------- main ---------------------------------------
if __name__ == "__main__":
    # small, forward-consistent shapes
    VOCAB, BLOCK, N_LAYER, N_HEAD, D = 128, 16, 2, 4, 32
    B, T = 2, 8

    key = jax.random.PRNGKey(0)

    def nrm(k, shape, std=0.02):
        return (std * jax.random.normal(k, shape)).astype(jnp.float32)

    keys = iter(jax.random.split(key, 64))
    wte = nrm(next(keys), (VOCAB, D))
    wpe = nrm(next(keys), (BLOCK, D))
    wh = nrm(next(keys), (D, VOCAB))
    gf = jnp.ones((1, D), jnp.float32)

    layers_ref = []
    wqkv_l, wo_l, g1_l, w1_l, w2_l, g2_l = [], [], [], [], [], []
    for _ in range(N_LAYER):
        wq = nrm(next(keys), (D, D))
        wk = nrm(next(keys), (D, D))
        wv = nrm(next(keys), (D, D))
        wo = nrm(next(keys), (D, D))
        w1 = nrm(next(keys), (D, 4 * D))
        w2 = nrm(next(keys), (4 * D, D))
        g1 = jnp.ones((D,), jnp.float32)
        g2 = jnp.ones((D,), jnp.float32)
        layers_ref.append(dict(wq=wq, wk=wk, wv=wv, wo=wo,
                               w1=w1, w2=w2, g1=g1, g2=g2))
        # fused QKV weight: [Q | K | V] along the output dim (lane-dense)
        wqkv_l.append(jnp.concatenate([wq, wk, wv], axis=1))
        wo_l.append(wo)
        w1_l.append(w1)
        w2_l.append(w2)
        g1_l.append(g1.reshape(1, D))
        g2_l.append(g2.reshape(1, D))

    params = {
        "wte": wte, "wpe": wpe, "gf": gf,
        "wh": wh.astype(jnp.bfloat16),                    # (D, V) bf16
        "wqkv": jnp.stack(wqkv_l).astype(jnp.bfloat16),   # (L, D, 3D) bf16
        "wo": jnp.stack(wo_l).astype(jnp.bfloat16),       # (L, D, D) bf16
        "g1": jnp.stack(g1_l),                            # (L, 1, D) fp32
        "g2": jnp.stack(g2_l),                            # (L, 1, D) fp32
        "w1": jnp.stack(w1_l).astype(jnp.bfloat16),       # (L, D, 4D) bf16
        "w2": jnp.stack(w2_l).astype(jnp.bfloat16),       # (L, 4D, D) bf16
        "n_head": N_HEAD,
    }

    idx = jax.random.randint(jax.random.PRNGKey(1), (B, T), 0, VOCAB)

    logits = model_forward(idx, params)
    jax.block_until_ready(logits)

    ref = reference_forward(idx, wte, wpe, layers_ref, gf, wh, N_HEAD)
    assert logits.shape == (B, T, VOCAB)
    # bf16 matmul operands (fp32 accumulation) + approx softmax reciprocal
    # => slightly looser tolerance vs the pure-fp32 reference.
    assert jnp.allclose(logits, ref, rtol=2e-2, atol=2e-3), "mismatch vs reference"

    print("KERNEL_OK")
</pallas_src>

<mosaic_0001>
module attributes {stable_mosaic.version = 11 : i64} {
  func.func @kernel(%arg0: i32, %arg1: i32, %arg2: memref<1x8x32xf32, #tpu.memory_space<vmem>>, %arg3: memref<1x32x96xbf16, #tpu.memory_space<vmem>>, %arg4: memref<1x32x32xbf16, #tpu.memory_space<vmem>>, %arg5: memref<1x1x32xf32, #tpu.memory_space<vmem>>, %arg6: memref<1x32x128xbf16, #tpu.memory_space<vmem>>, %arg7: memref<1x128x32xbf16, #tpu.memory_space<vmem>>, %arg8: memref<1x1x32xf32, #tpu.memory_space<vmem>>, %arg9: memref<1x32xf32, #tpu.memory_space<vmem>>, %arg10: memref<1x8x32xf32, #tpu.memory_space<vmem>>, %arg11: memref<8x32xbf16, #tpu.memory_space<vmem>>) attributes {dimension_semantics = [#tpu.dimension_semantics<parallel>, #tpu.dimension_semantics<arbitrary>], iteration_bounds = array<i64: 2, 2>, scalar_prefetch = 0 : i64, scratch_operands = 1 : i64, tpu.core_type = #tpu.core_type<tc>, window_params = [{transform_indices = @transform_0, window_bounds = array<i64: 1, 8, 32>}, {transform_indices = @transform_1, window_bounds = array<i64: 1, 32, 96>}, {transform_indices = @transform_2, window_bounds = array<i64: 1, 32, 32>}, {transform_indices = @transform_3, window_bounds = array<i64: 1, 1, 32>}, {transform_indices = @transform_4, window_bounds = array<i64: 1, 32, 128>}, {transform_indices = @transform_5, window_bounds = array<i64: 1, 128, 32>}, {transform_indices = @transform_6, window_bounds = array<i64: 1, 1, 32>}, {pipeline_mode = #tpu.pipeline_mode<synchronous>, transform_indices = @transform_7, window_bounds = array<i64: 1, 32>}, {transform_indices = @transform_8, window_bounds = array<i64: 1, 8, 32>}]} {
    %c0_i32 = arith.constant 0 : i32
    %0 = arith.cmpi eq, %arg1, %c0_i32 : i32
    %1 = arith.extui %0 : i1 to i32
    %c0_i32_0 = arith.constant 0 : i32
    %2 = arith.cmpi ne, %1, %c0_i32_0 : i32
    scf.if %2 {
      %c0_65 = arith.constant 0 : index
      %c0_66 = arith.constant 0 : index
      %c0_67 = arith.constant 0 : index
      %157 = vector.load %arg2[%c0_65, %c0_66, %c0_67] : memref<1x8x32xf32, #tpu.memory_space<vmem>>, vector<1x8x32xf32>
      %c0_68 = arith.constant 0 : index
      %c0_69 = arith.constant 0 : index
      %c0_70 = arith.constant 0 : index
      %158 = vector.load %arg10[%c0_68, %c0_69, %c0_70] : memref<1x8x32xf32, #tpu.memory_space<vmem>>, vector<1x8x32xf32>
      tpu.vector_store %arg10[%c0_68, %c0_69, %c0_70], %157 {strides = array<i32>} : memref<1x8x32xf32, #tpu.memory_space<vmem>>, vector<1x8x32xf32>,
    } else {
    }
    %c0 = arith.constant 0 : index
    %c0_1 = arith.constant 0 : index
    %c0_2 = arith.constant 0 : index
    %3 = vector.load %arg10[%c0, %c0_1, %c0_2] : memref<1x8x32xf32, #tpu.memory_space<vmem>>, vector<1x8x32xf32>
    %4 = vector.shape_cast %3 : vector<1x8x32xf32> to vector<8x32xf32>
    %5 = arith.truncf %4 : vector<8x32xf32> to vector<8x32xbf16>
    %c0_3 = arith.constant 0 : index
    %c0_4 = arith.constant 0 : index
    %c0_5 = arith.constant 0 : index
    %6 = vector.load %arg3[%c0_3, %c0_4, %c0_5] : memref<1x32x96xbf16, #tpu.memory_space<vmem>>, vector<1x32x96xbf16>
    %7 = vector.shape_cast %6 : vector<1x32x96xbf16> to vector<32x96xbf16>
    %cst = arith.constant dense<0.000000e+00> : vector<8x96xf32>
    %8 = tpu.matmul %5, %7, %cst {dimension_numbers = #tpu.dot_dimension_numbers<[1], [0], [0], [1], [0, 0, 1, 1], [], []>} : vector<8x32xbf16>, vector<32x96xbf16>, vector<8x96xf32> -> vector<8x96xf32>
    %9 = arith.truncf %8 : vector<8x96xf32> to vector<8x96xbf16>
    %10 = vector.shape_cast %9 : vector<8x96xbf16> to vector<1x8x96xbf16>
    %11 = vector.extract_strided_slice %10 {offsets = [0, 0, 0], sizes = [1, 8, 8], strides = [1, 1, 1]} : vector<1x8x96xbf16> to vector<1x8x8xbf16>
    %12 = vector.extract_strided_slice %10 {offsets = [0, 0, 32], sizes = [1, 8, 8], strides = [1, 1, 1]} : vector<1x8x96xbf16> to vector<1x8x8xbf16>
    %13 = vector.extract_strided_slice %10 {offsets = [0, 0, 64], sizes = [1, 8, 8], strides = [1, 1, 1]} : vector<1x8x96xbf16> to vector<1x8x8xbf16>
    "tpu.trace_start"() <{level = 10 : i32, message = "bqd,bkd->bqk"}> : () -> ()
    %cst_6 = arith.constant dense<0.000000e+00> : vector<1x8x8xf32>
    %14 = tpu.matmul %11, %12, %cst_6 {dimension_numbers = #tpu.dot_dimension_numbers<[2], [2], [1], [1], [0, 0, 0, 1, 1, 1], [0], [0]>} : vector<1x8x8xbf16>, vector<1x8x8xbf16>, vector<1x8x8xf32> -> vector<1x8x8xf32>
    "tpu.trace_stop"() : () -> ()
    %cst_7 = arith.constant 0.353553385 : f32
    %15 = vector.broadcast %cst_7 : f32 to vector<1x8x8xf32>
    %16 = arith.mulf %14, %15 : vector<1x8x8xf32>
    %cst_8 = arith.constant dense<0xFF800000> : vector<1x8xf32>
    %17 = vector.multi_reduction <maximumf>, %16, %cst_8 [2] : vector<1x8x8xf32> to vector<1x8xf32>
    %18 = vector.shape_cast %17 : vector<1x8xf32> to vector<1x8x1xf32>
    %19 = vector.broadcast %18 : vector<1x8x1xf32> to vector<1x8x8xf32>
    %20 = arith.subf %16, %19 : vector<1x8x8xf32>
    %21 = math.exp %20 : vector<1x8x8xf32>
    %cst_9 = arith.constant dense<0.000000e+00> : vector<1x8xf32>
    %22 = vector.multi_reduction <add>, %21, %cst_9 [2] : vector<1x8x8xf32> to vector<1x8xf32>
    %23 = vector.shape_cast %22 : vector<1x8xf32> to vector<1x8x1xf32>
    %24 = tpu.reciprocal %23 {approx = true} : vector<1x8x1xf32> -> vector<1x8x1xf32>
    %25 = vector.broadcast %24 : vector<1x8x1xf32> to vector<1x8x8xf32>
    %26 = arith.mulf %21, %25 : vector<1x8x8xf32>
    %27 = arith.truncf %26 : vector<1x8x8xf32> to vector<1x8x8xbf16>
    "tpu.trace_start"() <{level = 10 : i32, message = "bqk,bkd->bqd"}> : () -> ()
    %cst_10 = arith.constant dense<0.000000e+00> : vector<1x8x8xf32>
    %28 = tpu.matmul %27, %13, %cst_10 {dimension_numbers = #tpu.dot_dimension_numbers<[2], [1], [1], [2], [0, 0, 0, 1, 1, 2], [0], [0]>} : vector<1x8x8xbf16>, vector<1x8x8xbf16>, vector<1x8x8xf32> -> vector<1x8x8xf32>
    "tpu.trace_stop"() : () -> ()
    %29 = vector.shape_cast %28 : vector<1x8x8xf32> to vector<8x8xf32>
    %30 = arith.truncf %29 : vector<8x8xf32> to vector<8x8xbf16>
    %c0_11 = arith.constant 0 : index
    %c0_12 = arith.constant 0 : index
    %31 = vector.load %arg11[%c0_11, %c0_12] : memref<8x32xbf16, #tpu.memory_space<vmem>>, vector<8x8xbf16>
    tpu.vector_store %arg11[%c0_11, %c0_12], %30 {strides = array<i32>} : memref<8x32xbf16, #tpu.memory_space<vmem>>, vector<8x8xbf16>,
    %32 = vector.extract_strided_slice %10 {offsets = [0, 0, 8], sizes = [1, 8, 8], strides = [1, 1, 1]} : vector<1x8x96xbf16> to vector<1x8x8xbf16>
    %33 = vector.extract_strided_slice %10 {offsets = [0, 0, 40], sizes = [1, 8, 8], strides = [1, 1, 1]} : vector<1x8x96xbf16> to vector<1x8x8xbf16>
    %34 = vector.extract_strided_slice %10 {offsets = [0, 0, 72], sizes = [1, 8, 8], strides = [1, 1, 1]} : vector<1x8x96xbf16> to vector<1x8x8xbf16>
    "tpu.trace_start"() <{level = 10 : i32, message = "bqd,bkd->bqk"}> : () -> ()
    %cst_13 = arith.constant dense<0.000000e+00> : vector<1x8x8xf32>
    %35 = tpu.matmul %32, %33, %cst_13 {dimension_numbers = #tpu.dot_dimension_numbers<[2], [2], [1], [1], [0, 0, 0, 1, 1, 1], [0], [0]>} : vector<1x8x8xbf16>, vector<1x8x8xbf16>, vector<1x8x8xf32> -> vector<1x8x8xf32>
    "tpu.trace_stop"() : () -> ()
    %cst_14 = arith.constant 0.353553385 : f32
    %36 = vector.broadcast %cst_14 : f32 to vector<1x8x8xf32>
    %37 = arith.mulf %35, %36 : vector<1x8x8xf32>
    %cst_15 = arith.constant dense<0xFF800000> : vector<1x8xf32>
    %38 = vector.multi_reduction <maximumf>, %37, %cst_15 [2] : vector<1x8x8xf32> to vector<1x8xf32>
    %39 = vector.shape_cast %38 : vector<1x8xf32> to vector<1x8x1xf32>
    %40 = vector.broadcast %39 : vector<1x8x1xf32> to vector<1x8x8xf32>
    %41 = arith.subf %37, %40 : vector<1x8x8xf32>
    %42 = math.exp %41 : vector<1x8x8xf32>
    %cst_16 = arith.constant dense<0.000000e+00> : vector<1x8xf32>
    %43 = vector.multi_reduction <add>, %42, %cst_16 [2] : vector<1x8x8xf32> to vector<1x8xf32>
    %44 = vector.shape_cast %43 : vector<1x8xf32> to vector<1x8x1xf32>
    %45 = tpu.reciprocal %44 {approx = true} : vector<1x8x1xf32> -> vector<1x8x1xf32>
    %46 = vector.broadcast %45 : vector<1x8x1xf32> to vector<1x8x8xf32>
    %47 = arith.mulf %42, %46 : vector<1x8x8xf32>
    %48 = arith.truncf %47 : vector<1x8x8xf32> to vector<1x8x8xbf16>
    "tpu.trace_start"() <{level = 10 : i32, message = "bqk,bkd->bqd"}> : () -> ()
    %cst_17 = arith.constant dense<0.000000e+00> : vector<1x8x8xf32>
    %49 = tpu.matmul %48, %34, %cst_17 {dimension_numbers = #tpu.dot_dimension_numbers<[2], [1], [1], [2], [0, 0, 0, 1, 1, 2], [0], [0]>} : vector<1x8x8xbf16>, vector<1x8x8xbf16>, vector<1x8x8xf32> -> vector<1x8x8xf32>
    "tpu.trace_stop"() : () -> ()
    %50 = vector.shape_cast %49 : vector<1x8x8xf32> to vector<8x8xf32>
    %51 = arith.truncf %50 : vector<8x8xf32> to vector<8x8xbf16>
    %c0_18 = arith.constant 0 : index
    %c8 = arith.constant 8 : index
    %52 = vector.load %arg11[%c0_18, %c8] : memref<8x32xbf16, #tpu.memory_space<vmem>>, vector<8x8xbf16>
    tpu.vector_store %arg11[%c0_18, %c8], %51 {strides = array<i32>} : memref<8x32xbf16, #tpu.memory_space<vmem>>, vector<8x8xbf16>,
    %53 = vector.extract_strided_slice %10 {offsets = [0, 0, 16], sizes = [1, 8, 8], strides = [1, 1, 1]} : vector<1x8x96xbf16> to vector<1x8x8xbf16>
    %54 = vector.extract_strided_slice %10 {offsets = [0, 0, 48], sizes = [1, 8, 8], strides = [1, 1, 1]} : vector<1x8x96xbf16> to vector<1x8x8xbf16>
    %55 = vector.extract_strided_slice %10 {offsets = [0, 0, 80], sizes = [1, 8, 8], strides = [1, 1, 1]} : vector<1x8x96xbf16> to vector<1x8x8xbf16>
    "tpu.trace_start"() <{level = 10 : i32, message = "bqd,bkd->bqk"}> : () -> ()
    %cst_19 = arith.constant dense<0.000000e+00> : vector<1x8x8xf32>
    %56 = tpu.matmul %53, %54, %cst_19 {dimension_numbers = #tpu.dot_dimension_numbers<[2], [2], [1], [1], [0, 0, 0, 1, 1, 1], [0], [0]>} : vector<1x8x8xbf16>, vector<1x8x8xbf16>, vector<1x8x8xf32> -> vector<1x8x8xf32>
    "tpu.trace_stop"() : () -> ()
    %cst_20 = arith.constant 0.353553385 : f32
    %57 = vector.broadcast %cst_20 : f32 to vector<1x8x8xf32>
    %58 = arith.mulf %56, %57 : vector<1x8x8xf32>
    %cst_21 = arith.constant dense<0xFF800000> : vector<1x8xf32>
    %59 = vector.multi_reduction <maximumf>, %58, %cst_21 [2] : vector<1x8x8xf32> to vector<1x8xf32>
    %60 = vector.shape_cast %59 : vector<1x8xf32> to vector<1x8x1xf32>
    %61 = vector.broadcast %60 : vector<1x8x1xf32> to vector<1x8x8xf32>
    %62 = arith.subf %58, %61 : vector<1x8x8xf32>
    %63 = math.exp %62 : vector<1x8x8xf32>
    %cst_22 = arith.constant dense<0.000000e+00> : vector<1x8xf32>
    %64 = vector.multi_reduction <add>, %63, %cst_22 [2] : vector<1x8x8xf32> to vector<1x8xf32>
    %65 = vector.shape_cast %64 : vector<1x8xf32> to vector<1x8x1xf32>
    %66 = tpu.reciprocal %65 {approx = true} : vector<1x8x1xf32> -> vector<1x8x1xf32>
    %67 = vector.broadcast %66 : vector<1x8x1xf32> to vector<1x8x8xf32>
    %68 = arith.mulf %63, %67 : vector<1x8x8xf32>
    %69 = arith.truncf %68 : vector<1x8x8xf32> to vector<1x8x8xbf16>
    "tpu.trace_start"() <{level = 10 : i32, message = "bqk,bkd->bqd"}> : () -> ()
    %cst_23 = arith.constant dense<0.000000e+00> : vector<1x8x8xf32>
    %70 = tpu.matmul %69, %55, %cst_23 {dimension_numbers = #tpu.dot_dimension_numbers<[2], [1], [1], [2], [0, 0, 0, 1, 1, 2], [0], [0]>} : vector<1x8x8xbf16>, vector<1x8x8xbf16>, vector<1x8x8xf32> -> vector<1x8x8xf32>
    "tpu.trace_stop"() : () -> ()
    %71 = vector.shape_cast %70 : vector<1x8x8xf32> to vector<8x8xf32>
    %72 = arith.truncf %71 : vector<8x8xf32> to vector<8x8xbf16>
    %c0_24 = arith.constant 0 : index
    %c16 = arith.constant 16 : index
    %73 = vector.load %arg11[%c0_24, %c16] : memref<8x32xbf16, #tpu.memory_space<vmem>>, vector<8x8xbf16>
    tpu.vector_store %arg11[%c0_24, %c16], %72 {strides = array<i32>} : memref<8x32xbf16, #tpu.memory_space<vmem>>, vector<8x8xbf16>,
    %74 = vector.extract_strided_slice %10 {offsets = [0, 0, 24], sizes = [1, 8, 8], strides = [1, 1, 1]} : vector<1x8x96xbf16> to vector<1x8x8xbf16>
    %75 = vector.extract_strided_slice %10 {offsets = [0, 0, 56], sizes = [1, 8, 8], strides = [1, 1, 1]} : vector<1x8x96xbf16> to vector<1x8x8xbf16>
    %76 = vector.extract_strided_slice %10 {offsets = [0, 0, 88], sizes = [1, 8, 8], strides = [1, 1, 1]} : vector<1x8x96xbf16> to vector<1x8x8xbf16>
    "tpu.trace_start"() <{level = 10 : i32, message = "bqd,bkd->bqk"}> : () -> ()
    %cst_25 = arith.constant dense<0.000000e+00> : vector<1x8x8xf32>
    %77 = tpu.matmul %74, %75, %cst_25 {dimension_numbers = #tpu.dot_dimension_numbers<[2], [2], [1], [1], [0, 0, 0, 1, 1, 1], [0], [0]>} : vector<1x8x8xbf16>, vector<1x8x8xbf16>, vector<1x8x8xf32> -> vector<1x8x8xf32>
    "tpu.trace_stop"() : () -> ()
    %cst_26 = arith.constant 0.353553385 : f32
    %78 = vector.broadcast %cst_26 : f32 to vector<1x8x8xf32>
    %79 = arith.mulf %77, %78 : vector<1x8x8xf32>
    %cst_27 = arith.constant dense<0xFF800000> : vector<1x8xf32>
    %80 = vector.multi_reduction <maximumf>, %79, %cst_27 [2] : vector<1x8x8xf32> to vector<1x8xf32>
    %81 = vector.shape_cast %80 : vector<1x8xf32> to vector<1x8x1xf32>
    %82 = vector.broadcast %81 : vector<1x8x1xf32> to vector<1x8x8xf32>
    %83 = arith.subf %79, %82 : vector<1x8x8xf32>
    %84 = math.exp %83 : vector<1x8x8xf32>
    %cst_28 = arith.constant dense<0.000000e+00> : vector<1x8xf32>
    %85 = vector.multi_reduction <add>, %84, %cst_28 [2] : vector<1x8x8xf32> to vector<1x8xf32>
    %86 = vector.shape_cast %85 : vector<1x8xf32> to vector<1x8x1xf32>
    %87 = tpu.reciprocal %86 {approx = true} : vector<1x8x1xf32> -> vector<1x8x1xf32>
    %88 = vector.broadcast %87 : vector<1x8x1xf32> to vector<1x8x8xf32>
    %89 = arith.mulf %84, %88 : vector<1x8x8xf32>
    %90 = arith.truncf %89 : vector<1x8x8xf32> to vector<1x8x8xbf16>
    "tpu.trace_start"() <{level = 10 : i32, message = "bqk,bkd->bqd"}> : () -> ()
    %cst_29 = arith.constant dense<0.000000e+00> : vector<1x8x8xf32>
    %91 = tpu.matmul %90, %76, %cst_29 {dimension_numbers = #tpu.dot_dimension_numbers<[2], [1], [1], [2], [0, 0, 0, 1, 1, 2], [0], [0]>} : vector<1x8x8xbf16>, vector<1x8x8xbf16>, vector<1x8x8xf32> -> vector<1x8x8xf32>
    "tpu.trace_stop"() : () -> ()
    %92 = vector.shape_cast %91 : vector<1x8x8xf32> to vector<8x8xf32>
    %93 = arith.truncf %92 : vector<8x8xf32> to vector<8x8xbf16>
    %c0_30 = arith.constant 0 : index
    %c24 = arith.constant 24 : index
    %94 = vector.load %arg11[%c0_30, %c24] : memref<8x32xbf16, #tpu.memory_space<vmem>>, vector<8x8xbf16>
    tpu.vector_store %arg11[%c0_30, %c24], %93 {strides = array<i32>} : memref<8x32xbf16, #tpu.memory_space<vmem>>, vector<8x8xbf16>,
    %c0_31 = arith.constant 0 : index
    %c0_32 = arith.constant 0 : index
    %95 = vector.load %arg11[%c0_31, %c0_32] : memref<8x32xbf16, #tpu.memory_space<vmem>>, vector<8x32xbf16>
    %c0_33 = arith.constant 0 : index
    %c0_34 = arith.constant 0 : index
    %c0_35 = arith.constant 0 : index
    %96 = vector.load %arg4[%c0_33, %c0_34, %c0_35] : memref<1x32x32xbf16, #tpu.memory_space<vmem>>, vector<1x32x32xbf16>
    %97 = vector.shape_cast %96 : vector<1x32x32xbf16> to vector<32x32xbf16>
    %cst_36 = arith.constant dense<0.000000e+00> : vector<8x32xf32>
    %98 = tpu.matmul %95, %97, %cst_36 {dimension_numbers = #tpu.dot_dimension_numbers<[1], [0], [0], [1], [0, 0, 1, 1], [], []>} : vector<8x32xbf16>, vector<32x32xbf16>, vector<8x32xf32> -> vector<8x32xf32>
    %99 = arith.addf %4, %98 : vector<8x32xf32>
    %c0_37 = arith.constant 0 : index
    %c0_38 = arith.constant 0 : index
    %c0_39 = arith.constant 0 : index
    %100 = vector.load %arg5[%c0_37, %c0_38, %c0_39] : memref<1x1x32xf32, #tpu.memory_space<vmem>>, vector<1x1x32xf32>
    %101 = vector.shape_cast %100 : vector<1x1x32xf32> to vector<1x32xf32>
    %cst_40 = arith.constant dense<0.000000e+00> : vector<8xf32>
    %102 = vector.multi_reduction <add>, %99, %cst_40 [1] : vector<8x32xf32> to vector<8xf32>
    %103 = vector.shape_cast %102 : vector<8xf32> to vector<8x1xf32>
    %cst_41 = arith.constant 3.200000e+01 : f32
    %104 = vector.broadcast %cst_41 : f32 to vector<8x1xf32>
    %105 = arith.divf %103, %104 : vector<8x1xf32>
    %106 = vector.broadcast %105 : vector<8x1xf32> to vector<8x32xf32>
    %107 = arith.subf %99, %106 : vector<8x32xf32>
    %108 = arith.mulf %107, %107 : vector<8x32xf32>
    %cst_42 = arith.constant dense<0.000000e+00> : vector<8xf32>
    %109 = vector.multi_reduction <add>, %108, %cst_42 [1] : vector<8x32xf32> to vector<8xf32>
    %110 = vector.shape_cast %109 : vector<8xf32> to vector<8x1xf32>
    %cst_43 = arith.constant 3.200000e+01 : f32
    %111 = vector.broadcast %cst_43 : f32 to vector<8x1xf32>
    %112 = arith.divf %110, %111 : vector<8x1xf32>
    %cst_44 = arith.constant 9.99999974E-6 : f32
    %113 = vector.broadcast %cst_44 : f32 to vector<8x1xf32>
    %114 = arith.addf %112, %113 : vector<8x1xf32>
    %115 = math.rsqrt %114 : vector<8x1xf32>
    %116 = vector.broadcast %115 : vector<8x1xf32> to vector<8x32xf32>
    %117 = arith.mulf %107, %116 : vector<8x32xf32>
    %118 = vector.broadcast %101 : vector<1x32xf32> to vector<8x32xf32>
    %119 = arith.mulf %117, %118 : vector<8x32xf32>
    %120 = arith.truncf %119 : vector<8x32xf32> to vector<8x32xbf16>
    %c0_45 = arith.constant 0 : index
    %c0_46 = arith.constant 0 : index
    %c0_47 = arith.constant 0 : index
    %121 = vector.load %arg6[%c0_45, %c0_46, %c0_47] : memref<1x32x128xbf16, #tpu.memory_space<vmem>>, vector<1x32x128xbf16>
    %122 = vector.shape_cast %121 : vector<1x32x128xbf16> to vector<32x128xbf16>
    %cst_48 = arith.constant dense<0.000000e+00> : vector<8x128xf32>
    %123 = tpu.matmul %120, %122, %cst_48 {dimension_numbers = #tpu.dot_dimension_numbers<[1], [0], [0], [1], [0, 0, 1, 1], [], []>} : vector<8x32xbf16>, vector<32x128xbf16>, vector<8x128xf32> -> vector<8x128xf32>
    %cst_49 = arith.constant 0.000000e+00 : f32
    %124 = vector.broadcast %cst_49 : f32 to vector<8x128xf32>
    %125 = arith.maximumf %123, %124 : vector<8x128xf32>
    %126 = arith.truncf %125 : vector<8x128xf32> to vector<8x128xbf16>
    %c0_50 = arith.constant 0 : index
    %c0_51 = arith.constant 0 : index
    %c0_52 = arith.constant 0 : index
    %127 = vector.load %arg7[%c0_50, %c0_51, %c0_52] : memref<1x128x32xbf16, #tpu.memory_space<vmem>>, vector<1x128x32xbf16>
    %128 = vector.shape_cast %127 : vector<1x128x32xbf16> to vector<128x32xbf16>
    %cst_53 = arith.constant dense<0.000000e+00> : vector<8x32xf32>
    %129 = tpu.matmul %126, %128, %cst_53 {dimension_numbers = #tpu.dot_dimension_numbers<[1], [0], [0], [1], [0, 0, 1, 1], [], []>} : vector<8x128xbf16>, vector<128x32xbf16>, vector<8x32xf32> -> vector<8x32xf32>
    %130 = arith.addf %119, %129 : vector<8x32xf32>
    %c0_54 = arith.constant 0 : index
    %c0_55 = arith.constant 0 : index
    %c0_56 = arith.constant 0 : index
    %131 = vector.load %arg8[%c0_54, %c0_55, %c0_56] : memref<1x1x32xf32, #tpu.memory_space<vmem>>, vector<1x1x32xf32>
    %132 = vector.shape_cast %131 : vector<1x1x32xf32> to vector<1x32xf32>
    %cst_57 = arith.constant dense<0.000000e+00> : vector<8xf32>
    %133 = vector.multi_reduction <add>, %130, %cst_57 [1] : vector<8x32xf32> to vector<8xf32>
    %134 = vector.shape_cast %133 : vector<8xf32> to vector<8x1xf32>
    %cst_58 = arith.constant 3.200000e+01 : f32
    %135 = vector.broadcast %cst_58 : f32 to vector<8x1xf32>
    %136 = arith.divf %134, %135 : vector<8x1xf32>
    %137 = vector.broadcast %136 : vector<8x1xf32> to vector<8x32xf32>
    %138 = arith.subf %130, %137 : vector<8x32xf32>
    %139 = arith.mulf %138, %138 : vector<8x32xf32>
    %cst_59 = arith.constant dense<0.000000e+00> : vector<8xf32>
    %140 = vector.multi_reduction <add>, %139, %cst_59 [1] : vector<8x32xf32> to vector<8xf32>
    %141 = vector.shape_cast %140 : vector<8xf32> to vector<8x1xf32>
    %cst_60 = arith.constant 3.200000e+01 : f32
    %142 = vector.broadcast %cst_60 : f32 to vector<8x1xf32>
    %143 = arith.divf %141, %142 : vector<8x1xf32>
    %cst_61 = arith.constant 9.99999974E-6 : f32
    %144 = vector.broadcast %cst_61 : f32 to vector<8x1xf32>
    %145 = arith.addf %143, %144 : vector<8x1xf32>
    %146 = math.rsqrt %145 : vector<8x1xf32>
    %147 = vector.broadcast %146 : vector<8x1xf32> to vector<8x32xf32>
    %148 = arith.mulf %138, %147 : vector<8x32xf32>
    %149 = vector.broadcast %132 : vector<1x32xf32> to vector<8x32xf32>
    %150 = arith.mulf %148, %149 : vector<8x32xf32>
    %c1_i32 = arith.constant 1 : i32
    %151 = arith.cmpi eq, %arg1, %c1_i32 : i32
    %152 = arith.extui %151 : i1 to i32
    %c0_i32_62 = arith.constant 0 : i32
    %153 = arith.cmpi ne, %152, %c0_i32_62 : i32
    scf.if %153 {
      %c0_65 = arith.constant 0 : index
      %c0_66 = arith.constant 0 : index
      %157 = vector.load %arg9[%c0_65, %c0_66] : memref<1x32xf32, #tpu.memory_space<vmem>>, vector<1x32xf32>
      %cst_67 = arith.constant dense<0.000000e+00> : vector<8xf32>
      %158 = vector.multi_reduction <add>, %150, %cst_67 [1] : vector<8x32xf32> to vector<8xf32>
      %159 = vector.shape_cast %158 : vector<8xf32> to vector<8x1xf32>
      %cst_68 = arith.constant 3.200000e+01 : f32
      %160 = vector.broadcast %cst_68 : f32 to vector<8x1xf32>
      %161 = arith.divf %159, %160 : vector<8x1xf32>
      %162 = vector.broadcast %161 : vector<8x1xf32> to vector<8x32xf32>
      %163 = arith.subf %150, %162 : vector<8x32xf32>
      %164 = arith.mulf %163, %163 : vector<8x32xf32>
      %cst_69 = arith.constant dense<0.000000e+00> : vector<8xf32>
      %165 = vector.multi_reduction <add>, %164, %cst_69 [1] : vector<8x32xf32> to vector<8xf32>
      %166 = vector.shape_cast %165 : vector<8xf32> to vector<8x1xf32>
      %cst_70 = arith.constant 3.200000e+01 : f32
      %167 = vector.broadcast %cst_70 : f32 to vector<8x1xf32>
      %168 = arith.divf %166, %167 : vector<8x1xf32>
      %cst_71 = arith.constant 9.99999974E-6 : f32
      %169 = vector.broadcast %cst_71 : f32 to vector<8x1xf32>
      %170 = arith.addf %168, %169 : vector<8x1xf32>
      %171 = math.rsqrt %170 : vector<8x1xf32>
      %172 = vector.broadcast %171 : vector<8x1xf32> to vector<8x32xf32>
      %173 = arith.mulf %163, %172 : vector<8x32xf32>
      %174 = vector.broadcast %157 : vector<1x32xf32> to vector<8x32xf32>
      %175 = arith.mulf %173, %174 : vector<8x32xf32>
      %176 = vector.shape_cast %175 : vector<8x32xf32> to vector<1x8x32xf32>
      %c0_72 = arith.constant 0 : index
      %c0_73 = arith.constant 0 : index
      %c0_74 = arith.constant 0 : index
      %177 = vector.load %arg10[%c0_72, %c0_73, %c0_74] : memref<1x8x32xf32, #tpu.memory_space<vmem>>, vector<1x8x32xf32>
      tpu.vector_store %arg10[%c0_72, %c0_73, %c0_74], %176 {strides = array<i32>} : memref<1x8x32xf32, #tpu.memory_space<vmem>>, vector<1x8x32xf32>,
    } else {
    }
    %c1_i32_63 = arith.constant 1 : i32
    %154 = arith.cmpi ne, %arg1, %c1_i32_63 : i32
    %155 = arith.extui %154 : i1 to i32
    %c0_i32_64 = arith.constant 0 : i32
    %156 = arith.cmpi ne, %155, %c0_i32_64 : i32
    scf.if %156 {
      %157 = vector.shape_cast %150 : vector<8x32xf32> to vector<1x8x32xf32>
      %c0_65 = arith.constant 0 : index
      %c0_66 = arith.constant 0 : index
      %c0_67 = arith.constant 0 : index
      %158 = vector.load %arg10[%c0_65, %c0_66, %c0_67] : memref<1x8x32xf32, #tpu.memory_space<vmem>>, vector<1x8x32xf32>
      tpu.vector_store %arg10[%c0_65, %c0_66, %c0_67], %157 {strides = array<i32>} : memref<1x8x32xf32, #tpu.memory_space<vmem>>, vector<1x8x32xf32>,
    } else {
    }
    return
  }
  func.func @transform_0(%arg0: i32, %arg1: i32) -> (i32, i32, i32) {
    %c0_i32 = arith.constant 0 : i32
    %c0_i32_0 = arith.constant 0 : i32
    %c0_i32_1 = arith.constant 0 : i32
    return %arg0, %c0_i32, %c0_i32_0 : i32, i32, i32
  }
  func.func @transform_1(%arg0: i32, %arg1: i32) -> (i32, i32, i32) {
    %c0_i32 = arith.constant 0 : i32
    %c0_i32_0 = arith.constant 0 : i32
    %c0_i32_1 = arith.constant 0 : i32
    return %arg1, %c0_i32, %c0_i32_0 : i32, i32, i32
  }
  func.func @transform_2(%arg0: i32, %arg1: i32) -> (i32, i32, i32) {
    %c0_i32 = arith.constant 0 : i32
    %c0_i32_0 = arith.constant 0 : i32
    %c0_i32_1 = arith.constant 0 : i32
    return %arg1, %c0_i32, %c0_i32_0 : i32, i32, i32
  }
  func.func @transform_3(%arg0: i32, %arg1: i32) -> (i32, i32, i32) {
    %c0_i32 = arith.constant 0 : i32
    %c0_i32_0 = arith.constant 0 : i32
    %c0_i32_1 = arith.constant 0 : i32
    return %arg1, %c0_i32, %c0_i32_0 : i32, i32, i32
  }
  func.func @transform_4(%arg0: i32, %arg1: i32) -> (i32, i32, i32) {
    %c0_i32 = arith.constant 0 : i32
    %c0_i32_0 = arith.constant 0 : i32
    %c0_i32_1 = arith.constant 0 : i32
    return %arg1, %c0_i32, %c0_i32_0 : i32, i32, i32
  }
  func.func @transform_5(%arg0: i32, %arg1: i32) -> (i32, i32, i32) {
    %c0_i32 = arith.constant 0 : i32
    %c0_i32_0 = arith.constant 0 : i32
    %c0_i32_1 = arith.constant 0 : i32
    return %arg1, %c0_i32, %c0_i32_0 : i32, i32, i32
  }
  func.func @transform_6(%arg0: i32, %arg1: i32) -> (i32, i32, i32) {
    %c0_i32 = arith.constant 0 : i32
    %c0_i32_0 = arith.constant 0 : i32
    %c0_i32_1 = arith.constant 0 : i32
    return %arg1, %c0_i32, %c0_i32_0 : i32, i32, i32
  }
  func.func @transform_7(%arg0: i32, %arg1: i32) -> (i32, i32) {
    %c0_i32 = arith.constant 0 : i32
    %c0_i32_0 = arith.constant 0 : i32
    %c0_i32_1 = arith.constant 0 : i32
    return %c0_i32, %c0_i32_0 : i32, i32
  }
  func.func @transform_8(%arg0: i32, %arg1: i32) -> (i32, i32, i32) {
    %c0_i32 = arith.constant 0 : i32
    %c0_i32_0 = arith.constant 0 : i32
    %c0_i32_1 = arith.constant 0 : i32
    return %arg0, %c0_i32, %c0_i32_0 : i32, i32, i32
  }
}

</mosaic_0001>

<bundles_post_ra>
// kernel: tpu_custom_call.1
= control target key start
LH: loop header
LB: loop body
LE: loop exit
PB: predicated region body
PF: predicated region fallthrough
CT: control target
= control target key end

     0   :  { %s2174_s0 = inlined_call_operand.vmem [shape: f32[2,8,32], index: 0, kind: input, shape index: {}]   ;;  %s2175_s1 = inlined_call_operand.vmem [shape: bf16[2,32,96], index: 1, kind: input, shape index: {}]   ;;  %s2176_s2 = inlined_call_operand.vmem [shape: bf16[2,32,32], index: 2, kind: input, shape index: {}]   ;;  %s2177_s3 = inlined_call_operand.vmem [shape: f32[2,1,32], index: 3, kind: input, shape index: {}]   ;;  %s2178_s4 = inlined_call_operand.vmem [shape: bf16[2,32,128], index: 4, kind: input, shape index: {}]   ;;  %s2179_s5 = inlined_call_operand.vmem [shape: bf16[2,128,32], index: 5, kind: input, shape index: {}]   ;;  %s2180_s6 = inlined_call_operand.vmem [shape: f32[2,1,32], index: 6, kind: input, shape index: {}]   ;;  %s2181_s7 = inlined_call_operand.vmem [shape: f32[1,32], index: 7, kind: input, shape index: {}]   ;;  %s2182_s8 = inlined_call_operand.hbm [shape: f32[2,8,32], index: 8, kind: output, shape index: {}]  }
   0x1   :  { %2193 = sst [smem:[#allocation15_spill]] %s2174_s0 }
   0x2   :  { %2194 = sst [smem:[#allocation16_spill]] %s2182_s8 }
   0x3   :  { %13 = vsyncpa [#allocation4], 0 }
   0x4   :  { %15 = vsyncpa [#allocation4 + $0x1], 0  ;;  %s1884_s27 = smov 0   ;;  %s1886_s28 = smov 0  }
   0x5   :  { %s1888_s29 = smov 0   ;;  %s1890_s30 = smov 0  }
   0x6   :  { %s1892_s9 = smov 0   ;;  %s1894_s10 = smov 0  }
   0x7   :  { %s1896_s11 = smov 0   ;;  %s1898_s12 = smov 0  }
   0x8 LB: > { %2195 = sst [smem:[#allocation6_spill]] %s1792_s27  ;;  %s1419_s13 = sadd.s32 4294967295, %s1820_s12   ;;  %s1820_s12 = sphi %s1898_s12, %s21_s12   ;;  %s1816_s11 = sphi %s1896_s11, %s2220_s11   ;;  %s1812_s10 = sphi %s1894_s10, %s2216_s10   ;;  %s1808_s9 = sphi %s1892_s9, %s2215_s9   ;;  %s1804_s30 = sphi %s1890_s30, %s2214_s30   ;;  %s1800_s29 = sphi %s1888_s29, %s2213_s29   ;;  %s1796_s28 = sphi %s1886_s28, %s2219_s28   ;;  %s1792_s27 = sphi %s1884_s27, %s2218_s27  }
   0x9   : > { %2196 = sst [smem:[#allocation7_spill]] %s1800_s29  ;;  %s1420_s14 = sadd.s32 4294967294, %s1820_s12  }
   0xa   : > { %2197 = sst [smem:[#allocation8_spill]] %s1812_s10  ;;  %s30_s15 = sadd.s32 1, %s1812_s10 }
   0xb   : > { %2198 = sst [smem:[#allocation9_spill]] %s1816_s11  ;;  %p31_p0 = scmp.ge.s32.totalorder %s30_s15, 2 }
   0xc   : > { %2199 = sst [smem:[#allocation10_spill]] %s1820_s12  ;;  %s33_s16 = sadd.s32 1, %s1816_s11 }
   0xd   : > { %p253_p1 = scmp.ne.s32.totalorder %s1800_s29, %s1796_s28  ;;  %p254_p2 = scmp.eq.s32.totalorder %s1419_s13, 3 }
   0xe   : > { %s2222_s15 = smov (%p31_p0, %s30_s15), 0  ;;  %s2224_s16 = smov (!%p31_p0, %s33_s16), %s1816_s11 }
   0xf   : > { %2200 = sst [smem:[#allocation11_spill]] %s2222_s15  ;;  %p1933_p3 = por %p254_p2, %p253_p1 }
  0x10   : > { %p259_p4 = scmp.ne.s32.totalorder %s1796_s28, %s1792_s27  ;;  %p35_p5 = scmp.ge.s32.totalorder %s2224_s16, 2 }
  0x11   : > { %p260_p6 = scmp.eq.s32.totalorder %s1420_s14, 3  ;;  %p1423_p7 = scmp.ge.s32.totalorder %s1820_s12, 1 }
  0x12   : > { %p332_p8 = scmp.lt.s32.totalorder %s1820_s12, 5  ;;  %s2226_s16 = smov (%p35_p5, %s2224_s16), 0 }
  0x13   : > { %2202 = sst [smem:[#allocation12_spill]] %s2226_s16  ;;  %p1943_p9 = por %p260_p6, %p259_p4 }
  0x14   : > { %p333_p10 = pnand %p1423_p7, %p332_p8  ;;  %s240_s19 = ssub.s32 %s1816_s11, %s2226_s16 }
  0x15   : > { %s2203_s18 = scalar_select %p1943_p9, 1, 0 }
  0x16   : > { %s243_s20 = sadd.s32 1, %s1800_s29  ;;  %p241_p11 = scmp.eq.s32.totalorder %s240_s19, 0 }
  0x17   : > { %2204 = sst [smem:[#allocation13_spill]] %s2203_s18  ;;  %336 = sbr.rel (%p333_p10) target bundleno = 2796 (0xaec), region = 52 }
  0x18   : > { %s1951_s21 = scalar_select %p241_p11, %s1800_s29, %s243_s20  }
  0x19   : > { %s2186_s22 = sand.u32 (!%p333_p10), 1, %s1796_s28   ;;  %p391_p12 = scmp.lt.s32.totalorder (!%p333_p10), %s1808_s9, 1 }
  0x1a   : > { %2205 = sst [smem:[#allocation14_spill]] %s1951_s21  ;;  %s1424_s23 = sshll.u32 (!%p333_p10), %s2186_s22, 3 }
  0x1b   : > { %p395_p13 = scmp.lt.s32.totalorder (!%p333_p10), %s1804_s30, 1  ;;  %s2206_s0 = sld [smem:[#allocation15_spill]] (!%p333_p10) }
  0x1c   : > { %s392_s24 = scalar_select %p391_p12, %s1808_s9, 1 }
  0x1d   : > { %s1960_s25 = scalar_select %p395_p13, %s1804_s30, 1 }
  0x1e   : > { %s1425_s26 = sshll.u32 %s392_s24, 3  ;;  %s1993_s22 = scalar_lea.vmem [#allocation3], %s1424_s23 }
  0x1f   : > { %s1472_s20 = sshll.u32 %s1960_s25, 4  ;;  %s407_s27 = scalar_lea.vmem %s2177_s3, %s1960_s25 }
  0x20   : > { %s399_s11 = scalar_lea.vmem %s2175_s1, %s1472_s20  ;;  %s1972_s21 = scalar_lea.vmem %s2176_s2, %s1472_s20 }
  0x21   : > { %s394_s19 = scalar_lea.vmem %s2206_s0, %s1425_s26  ;;  %s1981_s8 = scalar_lea.vmem %s2178_s4, %s1472_s20 }
  0x22   : > { %s1475_s26 = sshll.u32 %s1960_s25, 6  ;;  %s420_s15 = scalar_lea.vmem %s2180_s6, %s1960_s25 }
  0x23   : > { %s1991_s10 = scalar_lea.vmem %s2179_s5, %s1475_s26  ;;  %p1434_p0 = scmp.ne.s32.totalorder %s1804_s30, 0 }
  0x25   : > { %425 = sbr.rel (%p1434_p0) target bundleno = 44 (0x2c), region = 56 }
  0x2a   : > { %v426_v0 = vld [vmem:[%s394_s19] sm:$0xff]  ;;  %vm427_vm0 = vcmask 261120  }
  0x2b   : > { %428 = vst.msk [vmem:[%s1993_s22] sm:$0xff] %vm427_vm0, %v426_v0 }
  0x2c PF: > { %v1692_v1 = vld [vmem:[%s399_s11 + $0x8] sm:$0xff]   ;;  %v1822_v2 = vmov 0.0   ;;  %v1693_v3 = vld [vmem:[%s399_s11] sm:$0xff]   ;;  %vm1823_vm1 = vmmov 0   ;;  %vm447_vm2 = vcmask 261120   ;;  %s1824_s0 = smov 120  }
  0x2d   : > { %1513 = vmatprep.subr.bf16.mxu0 %v1822_v2  ;;  %1533 = vmatprep.subr.bf16.mxu1 %v1822_v2  ;;  %s1825_s29 = smov 96   ;;  %s1826_s11 = smov 80   ;;  %vm495_vm3 = vcmask 64512   ;;  %vm560_vm4 = vcmask 1043456   ;;  %vm605_vm5 = vcmask 60416   ;;  %vm725_vm6 = vcmask 126016  }
  0x2e   : > { %1514 = vmatpush3.bf16.msra.mxu0 %v1692_v1  ;;  %1517 = vmatprep.mubr.msk.bf16.mxu0 %vm1823_vm1, %v1822_v2  ;;  %s1827_s12 = smov 88   ;;  %s1828_s18 = smov 72   ;;  %vm845_vm7 = vcmask 191616   ;;  %vm965_vm8 = vcmask 257216  }
  0x2f   : > { %1515 = vmatprep.subr.bf16.mxu0 %v1822_v2  ;;  %1535 = vmatprep.mubr.msk.bf16.mxu1 %vm1823_vm1, %v1822_v2  ;;  %s1829_s23 = smov 112   ;;  %s1830_s19 = smov 104  }
  0x30   : > { %s1831_s20 = smov 56   ;;  %s1832_s24 = smov 64  }
  0x31   : > { %s1833_s26 = smov 40   ;;  %s1834_s13 = smov 48  }
  0x32   : > { %v2002_v4 = vld [vmem:[%s1993_s22] sm:$0xff]  ;;  %1516 = vmatpush3.bf16.msra.mxu0 %v1693_v3  ;;  %s1835_s14 = smov 8   ;;  %s1836_s16 = smov 16  }
  0x33   : > { %v430_v5 = vpack.c.bf16 %v2002_v4, %v2002_v4  ;;  %1521 = vmatprep.subr.bf16.mxu0 %v1822_v2  ;;  %p1465_p1 = scmp.ne.s32.totalorder %s1804_s30, 1 }
  0x35   : > { %1518 = vmatmul.mubr.msk.bf16.vlgmr.msra.gmra.mxu0 %vm447_vm2, %v430_v5 }
  0x36   : > { %1523 = vmatprep.mubr.msk.bf16.mxu0 %vm1823_vm1, %v1822_v2 }
  0xf5   : > { %v485_v6 = vpop.f32.mrf.mxu0 }
  0xf6   : > { %v2013_v7 = vpack.c.bf16 %v485_v6, %v485_v6 }
  0xf7   : > { %v1519_v8 = vpop.f32.mrf.mxu0 }
  0xf8   : > { %607 = vrot.lane.b32.xlu1 %v2013_v7, %s1824_s0  ;;  %493 = vrot.lane.b32.xlu0 %v2013_v7, %s1825_s29  ;;  %s1837_s0 = smov 24  }
  0xf9   : > { %v488_v9 = vpop.f32.mrf.mxu0 }
  0xfb   : > { %v1520_v10 = vpop.f32.mrf.mxu0 }
  0xfc   : > { %729 = vrot.lane.b32.xlu1 %v2013_v7, %s1826_s11  ;;  %609 = vrot.lane.b32.xlu0 %v2013_v7, %s1827_s12 }
 0x100   : > { %849 = vrot.lane.b32.xlu1 %v2013_v7, %s1828_s18  ;;  %727 = vrot.lane.b32.xlu0 %v2013_v7, %s1829_s23 }
 0x104   : > { %847 = vrot.lane.b32.xlu0 %v2013_v7, %s1830_s19 }
 0x16a   : > { %v494_v11 = vpop.permute.xlu0 %493  ;;  %v608_v13 = vpop.permute.xlu1 %607 }
 0x16b   : > { %v500_v12 = vsel %vm495_vm3, %v494_v11, 0 }
 0x16c   : > { %1522 = vmatpush3.bf16.xpose.msra.mxu0 %v500_v12 }
 0x16d   : > { %1527 = vmatprep.subr.bf16.mxu0 %v1822_v2 }
 0x16e   : > { %v610_v14 = vpop.permute.xlu0 %609  ;;  %v730_v16 = vpop.permute.xlu1 %729 }
 0x16f   : > { %v615_v15 = vsel %vm495_vm3, %v610_v14, 0  ;;  %v735_v17 = vsel %vm495_vm3, %v730_v16, 0 }
 0x170   : > { %1534 = vmatpush3.bf16.xpose.msra.mxu1 %v615_v15 }
 0x171   : > { %1545 = vmatprep.subr.bf16.mxu1 %v1822_v2 }
 0x172   : > { %v850_v18 = vpop.permute.xlu1 %849  ;;  %v728_v19 = vpop.permute.xlu0 %727 }
 0x173   : > { %1524 = vmatmul.mubr.msk.bf16.vlgmr.msra.gmra.mxu0 %vm495_vm3, %v2013_v7  ;;  %v855_v20 = vsel %vm495_vm3, %v850_v18, 0 }
 0x174   : > { %1529 = vmatprep.mubr.msk.bf16.mxu0 %vm1823_vm1, %v1822_v2 }
 0x176   : > { %v848_v21 = vpop.permute.xlu0 %847 }
 0x177   : > { %1536 = vmatmul.mubr.msk.bf16.vlgmr.msra.gmra.mxu1 %vm495_vm3, %v608_v13 }
 0x178   : > { %1546 = vmatpush3.bf16.xpose.msra.mxu1 %v735_v17  ;;  %1547 = vmatprep.mubr.msk.bf16.mxu1 %vm1823_vm1, %v1822_v2 }
 0x179   : > { %1557 = vmatprep.subr.bf16.mxu1 %v1822_v2 }
 0x17f   : > { %1548 = vmatmul.mubr.msk.bf16.vlgmr.msra.gmra.mxu1 %vm495_vm3, %v728_v19 }
 0x180   : > { %1558 = vmatpush3.bf16.xpose.msra.mxu1 %v855_v20  ;;  %1559 = vmatprep.mubr.msk.bf16.mxu1 %vm1823_vm1, %v1822_v2 }
 0x181   : > { %1569 = vmatprep.subr.bf16.mxu1 %v1822_v2 }
 0x187   : > { %1560 = vmatmul.mubr.msk.bf16.vlgmr.msra.gmra.mxu1 %vm495_vm3, %v848_v21 }
 0x188   : > { %1573 = vmatprep.mubr.msk.bf16.mxu1 %vm1823_vm1, %v1822_v2 }
 0x233   : > { %v536_v22 = vpop.f32.mrf.mxu0 }
 0x234   : > { %v542_v23 = vmul.f32 0.35355338, %v536_v22 }
 0x235   : > { %v1525_v24 = vpop.f32.mrf.mxu0 }
 0x236   : > { %v543_v25 = vsel %vm495_vm3, %v542_v23, -inf }
 0x237   : > { %v651_v26 = vpop.f32.mrf.mxu1  ;;  %544 = vmax.xlane.f32.xlu1 %v543_v25  ;;  %v539_v27 = vpop.f32.mrf.mxu0 }
 0x238   : > { %v657_v28 = vmul.f32 0.35355338, %v651_v26 }
 0x239   : > { %v1526_v29 = vpop.f32.mrf.mxu0  ;;  %v1537_v30 = vpop.f32.mrf.mxu1 }
 0x23a   : > { %v658_v31 = vsel %vm495_vm3, %v657_v28, -inf }
 0x23b   : > { %659 = vmax.xlane.f32.xlu0 %v658_v31  ;;  %v654_v32 = vpop.f32.mrf.mxu1 }
 0x23d   : > { %v1538_v33 = vpop.f32.mrf.mxu1 }
 0x23f   : > { %v771_v34 = vpop.f32.mrf.mxu1 }
 0x240   : > { %v777_v35 = vmul.f32 0.35355338, %v771_v34 }
 0x241   : > { %v1549_v36 = vpop.f32.mrf.mxu1 }
 0x242   : > { %v778_v37 = vsel %vm495_vm3, %v777_v35, -inf }
 0x243   : > { %779 = vmax.xlane.f32.xlu0 %v778_v37  ;;  %v774_v38 = vpop.f32.mrf.mxu1 }
 0x244   : > { %v1694_v38 = vld [vmem:[%s1972_s21 + $0x8] sm:$0xff]  }
 0x245   : > { %v1550_v39 = vpop.f32.mrf.mxu1  ;;  %1570 = vmatpush3.bf16.msra.mxu1 %v1694_v38 }
 0x246   : > { %1571 = vmatprep.subr.bf16.mxu1 %v1822_v2 }
 0x247   : > { %v891_v40 = vpop.f32.mrf.mxu1 }
 0x248   : > { %v897_v41 = vmul.f32 0.35355338, %v891_v40 }
 0x249   : > { %v1561_v42 = vpop.f32.mrf.mxu1 }
 0x24a   : > { %v898_v43 = vsel %vm495_vm3, %v897_v41, -inf }
 0x24b   : > { %v894_v44 = vpop.f32.mrf.mxu1  ;;  %899 = vmax.xlane.f32.xlu1 %v898_v43 }
 0x24d   : > { %v1562_v45 = vpop.f32.mrf.mxu1 }
 0x2c0   : > { %v545_v46 = vpop.xlane.xlu1 %544 }
 0x2c1   : > { %v546_v47 = vsub.f32 %v542_v23, %v545_v46 }
 0x2c3   : > { %v547_v48 = vmul.f32 1.442695, %v546_v47 }
 0x2c4   : > { %v660_v49 = vpop.xlane.xlu0 %659 }
 0x2c5   : > { %1706 = vpow2.f32 %v547_v48  ;;  %v661_v50 = vsub.f32 %v657_v28, %v660_v49 }
 0x2c7   : > { %v662_v51 = vmul.f32 1.442695, %v661_v50 }
 0x2c9   : > { %1708 = vpow2.f32 %v662_v51 }
 0x2cc   : > { %v780_v52 = vpop.xlane.xlu0 %779 }
 0x2cd   : > { %v781_v53 = vsub.f32 %v777_v35, %v780_v52 }
 0x2cf   : > { %v782_v54 = vmul.f32 1.442695, %v781_v53 }
 0x2d1   : > { %1710 = vpow2.f32 %v782_v54 }
 0x2d2   : > { %v1707_v55 = vpop.eup %1706 }
 0x2d3   : > { %v549_v56 = vsel %vm495_vm3, %v1707_v55, 0.0 }
 0x2d4   : > { %550 = vadd.xlane.f32.xlu0 %v549_v56  ;;  %v900_v61 = vpop.xlane.xlu1 %899 }
 0x2d5   : > { %v901_v62 = vsub.f32 %v897_v41, %v900_v61  ;;  %v1695_v41 = vld [vmem:[%s1972_s21] sm:$0xff]  }
 0x2d6   : > { %v1709_v57 = vpop.eup %1708  ;;  %1572 = vmatpush3.bf16.msra.mxu1 %v1695_v41 }
 0x2d7   : > { %v664_v58 = vsel %vm495_vm3, %v1709_v57, 0.0  ;;  %v902_v63 = vmul.f32 1.442695, %v901_v62  ;;  %1585 = vmatprep.subr.bf16.mxu1 %v1822_v2 }
 0x2d8   : > { %665 = vadd.xlane.f32.xlu1 %v664_v58 }
 0x2d9   : > { %1712 = vpow2.f32 %v902_v63 }
 0x2de   : > { %v1711_v59 = vpop.eup %1710 }
 0x2df   : > { %v784_v60 = vsel %vm495_vm3, %v1711_v59, 0.0 }
 0x2e0   : > { %785 = vadd.xlane.f32.xlu0 %v784_v60 }
 0x2e6   : > { %v1713_v0 = vpop.eup %1712 }
 0x2e7   : > { %v904_v1 = vsel %vm495_vm3, %v1713_v0, 0.0 }
 0x2e9   : > { %670 = vrot.lane.b32.xlu1 %v2013_v7, %s1831_s20 }
 0x2f6   : > { %555 = vrot.lane.b32.xlu0 %v2013_v7, %s1832_s24 }
 0x2fa   : > { %910 = vrot.lane.b32.xlu0 %v2013_v7, %s1833_s26 }
 0x30d   : > { %905 = vadd.xlane.f32.xlu1 %v904_v1  ;;  %v1696_v1 = vld [vmem:[%s1981_s8 + $0x8] sm:$0xff]  }
 0x31e   : > { %790 = vrot.lane.b32.xlu1 %v2013_v7, %s1834_s13 }
 0x35d   : > { %v551_v3 = vpop.xlane.xlu0 %550 }
 0x35e   : > { %1714 = vrcp.f32 %v551_v3  ;;  %v1698_v3 = vld [vmem:[%s1991_s10 + $0x38] sm:$0xff]  }
 0x361   : > { %v666_v5 = vpop.xlane.xlu1 %665 }
 0x362   : > { %1716 = vrcp.f32 %v666_v5  ;;  %v1699_v5 = vld [vmem:[%s1991_s10 + $0x30] sm:$0xff]  }
 0x365   : > { %v671_v12 = vpop.permute.xlu1 %670 }
 0x366   : > { %v676_v15 = vsel %vm560_vm4, %v671_v12, 0 }
 0x369   : > { %v786_v6 = vpop.xlane.xlu0 %785 }
 0x36a   : > { %1718 = vrcp.f32 %v786_v6  ;;  %v1700_v6 = vld [vmem:[%s1991_s10 + $0x28] sm:$0xff]  }
 0x36b   : > { %v1715_v8 = vpop.eup %1714 }
 0x36c   : > { %v553_v9 = vmul.f32 %v1715_v8, %v1707_v55  ;;  %v1701_v8 = vld [vmem:[%s1991_s10 + $0x20] sm:$0xff]  }
 0x36d   : > { %v556_v10 = vpop.permute.xlu0 %555 }
 0x36e   : > { %v562_v11 = vsel %vm560_vm4, %v556_v10, 0  ;;  %v554_v13 = vpack.c.bf16 %v553_v9, %v553_v9  ;;  %v1702_v9 = vld [vmem:[%s1991_s10 + $0x18] sm:$0xff]   ;;  %v1703_v10 = vld [vmem:[%s1991_s10 + $0x10] sm:$0xff]  }
 0x36f   : > { %1528 = vmatpush3.bf16.msra.mxu0 %v562_v11  ;;  %v1717_v14 = vpop.eup %1716  ;;  %v1704_v11 = vld [vmem:[%s1991_s10 + $0x8] sm:$0xff]  }
 0x370   : > { %1539 = vmatprep.subr.bf16.mxu0 %v1822_v2  ;;  %v668_v7 = vmul.f32 %v1717_v14, %v1709_v57 }
 0x371   : > { %v911_v22 = vpop.permute.xlu0 %910 }
 0x372   : > { %1530 = vmatmul.mubr.msk.bf16.vlgmr.msra.gmra.mxu0 %vm495_vm3, %v554_v13  ;;  %v669_v16 = vpack.c.bf16 %v668_v7, %v668_v7  ;;  %v916_v24 = vsel %vm560_vm4, %v911_v22, 0  ;;  %v1452_v7 = vld [vmem:[%s407_s27] ss:$0 sm:$0xff] }
 0x373   : > { %1540 = vmatpush3.bf16.msra.mxu0 %v676_v15  ;;  %1541 = vmatprep.mubr.msk.bf16.mxu0 %vm1823_vm1, %v1822_v2 }
 0x374   : > { %1551 = vmatprep.subr.bf16.mxu0 %v1822_v2 }
 0x377   : > { %v1719_v17 = vpop.eup %1718 }
 0x378   : > { %v788_v19 = vmul.f32 %v1719_v17, %v1711_v59 }
 0x37a   : > { %1542 = vmatmul.mubr.msk.bf16.vlgmr.msra.gmra.mxu0 %vm495_vm3, %v669_v16  ;;  %v789_v23 = vpack.c.bf16 %v788_v19, %v788_v19  ;;  %v1705_v19 = vld [vmem:[%s1991_s10] sm:$0xff]  }
 0x37b   : > { %1553 = vmatprep.mubr.msk.bf16.mxu0 %vm1823_vm1, %v1822_v2 }
 0x396   : > { %v906_v18 = vpop.xlane.xlu1 %905 }
 0x397   : > { %1720 = vrcp.f32 %v906_v18 }
 0x39a   : > { %v791_v20 = vpop.permute.xlu1 %790 }
 0x39b   : > { %v796_v21 = vsel %vm560_vm4, %v791_v20, 0 }
 0x39c   : > { %1552 = vmatpush3.bf16.msra.mxu0 %v796_v21 }
 0x39d   : > { %1563 = vmatprep.subr.bf16.mxu0 %v1822_v2 }
 0x39f   : > { %1554 = vmatmul.mubr.msk.bf16.vlgmr.msra.gmra.mxu0 %vm495_vm3, %v789_v23 }
 0x3a0   : > { %1564 = vmatpush3.bf16.msra.mxu0 %v916_v24  ;;  %1565 = vmatprep.mubr.msk.bf16.mxu0 %vm1823_vm1, %v1822_v2 }
 0x3a1   : > { %1577 = vmatprep.subr.bf16.mxu0 %v1822_v2 }
 0x3a4   : > { %v1721_v25 = vpop.eup %1720 }
 0x3a5   : > { %v908_v26 = vmul.f32 %v1721_v25, %v1713_v0 }
 0x3a7   : > { %v909_v27 = vpack.c.bf16 %v908_v26, %v908_v26 }
 0x3a9   : > { %1566 = vmatmul.mubr.msk.bf16.vlgmr.msra.gmra.mxu0 %vm495_vm3, %v909_v27 }
 0x3aa   : > { %1581 = vmatprep.mubr.msk.bf16.mxu0 %vm1823_vm1, %v1822_v2  ;;  %1578 = vmatpush3.bf16.msra.mxu0 %v1696_v1 }
 0x3ab   : > { %1579 = vmatprep.subr.bf16.mxu0 %v1822_v2 }
 0x432   : > { %v598_v28 = vpop.f32.mrf.mxu0 }
 0x433   : > { %v604_v29 = vpack.c.bf16 %v598_v28, %v598_v28 }
 0x434   : > { %v1531_v30 = vpop.f32.mrf.mxu0 }
 0x435   : > { %606 = vst.msk [vmem:[#allocation2] sm:$0xf] %vm605_vm5, %v604_v29 }
 0x436   : > { %v601_v31 = vpop.f32.mrf.mxu0 }
 0x438   : > { %v1532_v32 = vpop.f32.mrf.mxu0 }
 0x43a   : > { %v712_v33 = vpop.f32.mrf.mxu0 }
 0x43b   : > { %v1476_v34 = vpack.c.bf16 %v712_v33, %v712_v33 }
 0x43c   : > { %v1543_v35 = vpop.f32.mrf.mxu0 }
 0x43d   : > { %722 = vrot.lane.b32.xlu1 %v1476_v34, %s1835_s14 }
 0x43e   : > { %v715_v36 = vpop.f32.mrf.mxu0 }
 0x440   : > { %v1544_v37 = vpop.f32.mrf.mxu0 }
 0x45f   : > { %v832_v39 = vpop.f32.mrf.mxu0 }
 0x460   : > { %v1477_v40 = vpack.c.bf16 %v832_v39, %v832_v39 }
 0x461   : > { %v1555_v42 = vpop.f32.mrf.mxu0 }
 0x462   : > { %842 = vrot.lane.b32.xlu0 %v1477_v40, %s1836_s16  ;;  %v1464_v40 = vld [vmem:[%s420_s15] ss:$0 sm:$0xff] }
 0x463   : > { %v835_v43 = vpop.f32.mrf.mxu0 }
 0x465   : > { %v1556_v44 = vpop.f32.mrf.mxu0 }
 0x469   : > { %v952_v45 = vpop.f32.mrf.mxu0 }
 0x46a   : > { %v1478_v46 = vpack.c.bf16 %v952_v45, %v952_v45 }
 0x46b   : > { %v1567_v47 = vpop.f32.mrf.mxu0 }
 0x46c   : > { %962 = vrot.lane.b32.xlu1 %v1478_v46, %s1837_s0 }
 0x46d   : > { %v955_v48 = vpop.f32.mrf.mxu0 }
 0x46f   : > { %v1568_v49 = vpop.f32.mrf.mxu0 }
 0x4af   : > { %v723_v50 = vpop.permute.xlu1 %722 }
 0x4b0   : > { %726 = vst.msk [vmem:[#allocation2] sm:$0xf] %vm725_vm6, %v723_v50 }
 0x4d4   : > { %v843_v51 = vpop.permute.xlu0 %842 }
 0x4d5   : > { %846 = vst.msk [vmem:[#allocation2] sm:$0xf] %vm845_vm7, %v843_v51 }
 0x4de   : > { %v963_v52 = vpop.permute.xlu1 %962 }
 0x4df   : > { %966 = vst.msk [vmem:[#allocation2] sm:$0xf] %vm965_vm8, %v963_v52 }
 0x4e6   : > { %v967_v53 = vld [vmem:[#allocation2] sm:$0xf] }
 0x4e7   : > { %1574 = vmatmul.mubr.msk.bf16.vlgmr.msra.gmra.mxu1 %vm447_vm2, %v967_v53 }
 0x4e8   : > { %1601 = vmatprep.mubr.msk.bf16.mxu1 %vm1823_vm1, %v1822_v2  ;;  %1586 = vmatpush3.bf16.msra.mxu1 %v1698_v3 }
 0x4e9   : > { %1587 = vmatprep.subr.bf16.mxu1 %v1822_v2 }
 0x4ec   : > { %1588 = vmatpush3.bf16.msra.mxu1 %v1699_v5 }
 0x4ed   : > { %1589 = vmatprep.subr.bf16.mxu1 %v1822_v2 }
 0x4f0   : > { %1590 = vmatpush3.bf16.msra.mxu1 %v1700_v6 }
 0x4f1   : > { %1591 = vmatprep.subr.bf16.mxu1 %v1822_v2 }
 0x4f4   : > { %1592 = vmatpush3.bf16.msra.mxu1 %v1701_v8 }
 0x4f5   : > { %1593 = vmatprep.subr.bf16.mxu1 %v1822_v2 }
 0x4f8   : > { %1594 = vmatpush3.bf16.msra.mxu1 %v1702_v9 }
 0x4f9   : > { %1595 = vmatprep.subr.bf16.mxu1 %v1822_v2 }
 0x4fc   : > { %1596 = vmatpush3.bf16.msra.mxu1 %v1703_v10 }
 0x4fd   : > { %1597 = vmatprep.subr.bf16.mxu1 %v1822_v2 }
 0x500   : > { %1598 = vmatpush3.bf16.msra.mxu1 %v1704_v11 }
 0x501   : > { %1599 = vmatprep.subr.bf16.mxu1 %v1822_v2 }
 0x504   : > { %1600 = vmatpush3.bf16.msra.mxu1 %v1705_v19 }
 0x5a7   : > { %v1021_v54 = vpop.f32.mrf.mxu1 }
 0x5a8   : > { %v1027_v55 = vadd.f32 %v1021_v54, %v2002_v4  ;;  %v1697_v4 = vld [vmem:[%s1981_s8] sm:$0xff]  }
 0x5a9   : > { %v1575_v56 = vpop.f32.mrf.mxu1  ;;  %1580 = vmatpush3.bf16.msra.mxu0 %v1697_v4 }
 0x5aa   : > { %v1029_v57 = vsel %vm447_vm2, %v1027_v55, 0.0 }
 0x5ab   : > { %1030 = vadd.xlane.f32.xlu0 %v1029_v57  ;;  %v1024_v58 = vpop.f32.mrf.mxu1 }
 0x5ad   : > { %v1576_v59 = vpop.f32.mrf.mxu1 }
 0x634   : > { %v1031_v60 = vpop.xlane.xlu0 %1030 }
 0x635   : > { %v1033_v61 = vmul.f32 0.03125, %v1031_v60 }
 0x637   : > { %v1034_v62 = vsub.f32 %v1027_v55, %v1033_v61 }
 0x639   : > { %v1035_v63 = vmul.f32 %v1034_v62, %v1034_v62 }
 0x63b   : > { %v1036_v0 = vsel %vm447_vm2, %v1035_v63, 0.0 }
 0x63c   : > { %1037 = vadd.xlane.f32.xlu1 %v1036_v0 }
 0x6c5   : > { %v1038_v12 = vpop.xlane.xlu1 %1037 }
 0x6c6   : > { %v1039_v13 = vmul.f32 0.03125, %v1038_v12 }
 0x6c8   : > { %v1040_v14 = vadd.f32 1e-05, %v1039_v13 }
 0x6ca   : > { %1722 = vrsqrt.f32 %v1040_v14 }
 0x6d7   : > { %v1723_v15 = vpop.eup %1722 }
 0x6d8   : > { %v1042_v16 = vmul.f32 %v1723_v15, %v1034_v62 }
 0x6da   : > { %v1049_v17 = vmul.f32 %v1452_v7, %v1042_v16 }
 0x6dc   : > { %v1050_v18 = vpack.c.bf16 %v1049_v17, %v1049_v17 }
 0x6de   : > { %1582 = vmatmul.mubr.msk.bf16.vlgmr.msra.gmra.mxu0 %vm447_vm2, %v1050_v18 }
 0x79e   : > { %v1104_v20 = vpop.f32.mrf.mxu0 }
 0x79f   : > { %v1110_v21 = vmax.f32 %v1104_v20, 0.0 }
 0x7a0   : > { %v1583_v2 = vpop.f32.mrf.mxu0 }
 0x7a1   : > { %v1111_v22 = vpack.c.bf16 %v1110_v21, %v1110_v21 }
 0x7a2   : > { %v1107_v23 = vpop.f32.mrf.mxu0 }
 0x7a3   : > { %1602 = vmatmul.mubr.bf16.vlgmr.msra.gmra.mxu1 %v1111_v22 }
 0x7a4   : > { %v1584_v24 = vpop.f32.mrf.mxu0 }
 0x863   : > { %v1210_v25 = vpop.f32.mrf.mxu1 }
 0x864   : > { %v1216_v26 = vadd.f32 %v1210_v25, %v1049_v17 }
 0x865   : > { %v1603_v27 = vpop.f32.mrf.mxu1 }
 0x866   : > { %v1218_v28 = vsel %vm447_vm2, %v1216_v26, 0.0 }
 0x867   : > { %1219 = vadd.xlane.f32.xlu0 %v1218_v28  ;;  %v1213_v29 = vpop.f32.mrf.mxu1 }
 0x869   : > { %v1604_v30 = vpop.f32.mrf.mxu1 }
 0x8f0   : > { %v1220_v31 = vpop.xlane.xlu0 %1219 }
 0x8f1   : > { %v1221_v32 = vmul.f32 0.03125, %v1220_v31 }
 0x8f3   : > { %v1222_v33 = vsub.f32 %v1216_v26, %v1221_v32 }
 0x8f5   : > { %v1223_v34 = vmul.f32 %v1222_v33, %v1222_v33 }
 0x8f7   : > { %v1224_v35 = vsel %vm447_vm2, %v1223_v34, 0.0 }
 0x8f8   : > { %1225 = vadd.xlane.f32.xlu0 %v1224_v35 }
 0x981   : > { %v1226_v36 = vpop.xlane.xlu0 %1225 }
 0x982   : > { %v1227_v37 = vmul.f32 0.03125, %v1226_v36 }
 0x984   : > { %v1228_v38 = vadd.f32 1e-05, %v1227_v37 }
 0x986   : > { %1724 = vrsqrt.f32 %v1228_v38 }
 0x992   : > { %1241 = sbr.rel (%p1465_p1) target bundleno = 2763 (0xacb), region = 60 }
 0x993   : > { %v1725_v39 = vpop.eup %1724 }
 0x994   : > { %v1230_v41 = vmul.f32 %v1725_v39, %v1222_v33 }
 0x996   : > { %v1237_v42 = vmul.f32 %v1464_v40, %v1230_v41 }
 0x997   : > { %v1466_v53 = vld [vmem:[%s2181_s7] ss:$0 sm:$0xff] }
 0x998   : > { %v1243_v43 = vsel %vm447_vm2, %v1237_v42, 0.0 }
 0x999   : > { %1244 = vadd.xlane.f32.xlu0 %v1243_v43 }
 0xa22   : > { %v1245_v44 = vpop.xlane.xlu0 %1244 }
 0xa23   : > { %v1246_v45 = vmul.f32 0.03125, %v1245_v44 }
 0xa25   : > { %v1247_v46 = vsub.f32 %v1237_v42, %v1246_v45 }
 0xa27   : > { %v1248_v47 = vmul.f32 %v1247_v46, %v1247_v46 }
 0xa29   : > { %v1249_v48 = vsel %vm447_vm2, %v1248_v47, 0.0 }
 0xa2a   : > { %1250 = vadd.xlane.f32.xlu0 %v1249_v48 }
 0xab3   : > { %v1251_v49 = vpop.xlane.xlu0 %1250 }
 0xab4   : > { %v1252_v50 = vmul.f32 0.03125, %v1251_v49 }
 0xab6   : > { %v1253_v51 = vadd.f32 1e-05, %v1252_v50 }
 0xab8   : > { %1726 = vrsqrt.f32 %v1253_v51 }
 0xac5   : > { %v1727_v52 = vpop.eup %1726 }
 0xac6   : > { %v1255_v54 = vmul.f32 %v1727_v52, %v1247_v46 }
 0xac8   : > { %v1262_v55 = vmul.f32 %v1466_v53, %v1255_v54 }
 0xaca   : > { %1263 = vst.msk [vmem:[%s1993_s22] sm:$0xff] %vm447_vm2, %v1262_v55 }
 0xacb PF: > { %p1467_p2 = scmp.eq.s32.totalorder %s1804_s30, 1 }
 0xacd   : > { %1267 = sbr.rel (%p1467_p2) target bundleno = 2771 (0xad3), region = 64 }
 0xad2   : > { %1268 = vst.msk [vmem:[%s1993_s22] sm:$0xff] %vm447_vm2, %v1237_v42 }
 0xad3 PF: > { %s1469_s29 = sshll.u32 %s1808_s9, 7  ;;  %s2207_s18 = sld [smem:[#allocation16_spill]] }
 0xad4   : > { %s1283_s19 = sshll.u32 %s1993_s22, 4  ;;  %s2208_s20 = sand.u32 1, %s1796_s28   ;;  %s1284_s19 = int_to_ptr.vmem [resolvable:$true] %s1283_s19 }
 0xad5   : > { %s1270_s24 = scalar_lea.sflag [#allocation4], %s2208_s20  ;;  %s1728_s26 = scalar_lea.vmem %s1284_s19, 128 }
 0xad6   : > { %p1729_p4 = scmp.ne.s32.totalorder %s1284_s19, %s1728_s26  ;;  %s1838_s30 = smov [#allocation3]  }
 0xad7   : > { %s1732_s13 = sshll.u32 %s1838_s30, 4  ;;  %s1733_s13 = int_to_ptr.vmem [resolvable:$false] %s1732_s13 }
 0xad8   : > { %p1730_p5 = pnand %p1729_p4, %p1933_p3  ;;  %s1734_s14 = scalar_lea.vmem %s1733_s13, 256 }
 0xad9   : > { %s1281_s23 = scalar_lea.hbm %s2207_s18, %s1469_s29  ;;  %p1735_p7 = scmp.lt.s32.totalorder %s1284_s19, %s1733_s13 }
 0xada   : > { %p1731_p6 = pneg %p1730_p5  ;;  %p1736_p8 = scmp.lt.s32.totalorder %s1734_s14, %s1728_s26 }
 0xadc   : > { %p1737_p10 = por %p1736_p8, %p1735_p7 }
 0xade   : > { %p1738_p11 = pnand %p1737_p10, %p1731_p6 }
 0xae0   : > { %1741 = shalt.err (!%p1738_p11)
}
 0xae1   : > { %s1742_s9 = scalar_lea.hbm %s1281_s23, 128  ;;  %s1746_s0 = scalar_lea.hbm %s2207_s18, 256 }
 0xae2   : > { %p1743_p12 = scmp.ne.s32.totalorder %s1281_s23, %s1742_s9  ;;  %p1747_p1 = scmp.lt.s32.totalorder %s1281_s23, %s2207_s18 }
 0xae3   : > { %p1748_p2 = scmp.lt.s32.totalorder %s1746_s0, %s1742_s9 }
 0xae4   : > { %p1744_p13 = pnand %p1743_p12, %p1933_p3 }
 0xae5   : > { %p1749_p4 = por %p1748_p2, %p1747_p1 }
 0xae6   : > { %p1745_p0 = pneg %p1744_p13 }
 0xae8   : > { %p1750_p5 = pnand %p1749_p4, %p1745_p0 }
 0xaea   : > { %1753 = shalt.err (!%p1750_p5)
}
 0xaeb   : > { %1605 = dma.vmem_to_hbm [thread:$0]  (%p1933_p3), %s1284_s19, 128, %s1281_s23, %s1270_s24  }
 0xaec PF: > { %s2209_s27 = sld [smem:[#allocation10_spill]] }
 0xaed   : > { %s2210_s10 = sld [smem:[#allocation6_spill]] }
 0xaf2   : > { %p1611_p6 = scmp.ge.s32.totalorder %s2209_s27, 2 }
 0xaf3   : > { %s1295_s15 = sand.u32 1, %s2210_s10  }
 0xaf4   : > { %p1608_p7 = pnand %p1611_p6, %p1943_p9  ;;  %s1296_s29 = scalar_lea.sflag [#allocation4], %s1295_s15 }
 0xaf6   : > { %p1609_p8 = pneg %p1608_p7 }
 0xaf8   : > { %1787 = dma.done.wait (%p1609_p8), %s1296_s29, 128  }
 0xaf9   : > { %1789 = vsyncadd (%p1609_p8), %s1296_s29, 4294967168  ;;  %s21_s12 = sadd.s32 1, %s2209_s27   ;;  %s2212_s11 = sld [smem:[#allocation7_spill]] }
 0xafa   : > { %p18_p10 = scmp.ge.s32.totalorder %s21_s12, 6   ;;  %s2213_s29 = sld [smem:[#allocation14_spill]] }
 0xafb   : > { %s2214_s30 = sld [smem:[#allocation8_spill]]  ;;  %s2218_s27 = smov %s1796_s28 }
 0xafc   : > { %s2215_s9 = sld [smem:[#allocation9_spill]] }
 0xafd   : > { %s2216_s10 = sld [smem:[#allocation11_spill]] }
 0xafe   : > { %s2217_s17 = sld [smem:[#allocation12_spill]] }
 0xaff   : > { %s2219_s28 = smov %s2212_s11 }
 0xb00   :  { %20 = sbr.rel (!%p18_p10) target bundleno = 8 (0x8), region = 117 }
 0xb04   : > { %s2220_s11 = smov %s2217_s17 }
 0xb05   :  { %1301 = vsyncpa [#allocation4], 1 }
 0xb06   :  { %1303 = vsyncpa [#allocation4 + $0x1], 1 }

</bundles_post_ra>
